<compile_context>
chip_gen: v6e
topology: v6e:2x2x1
jax: 0.10.0
libtpu: 0.0.40
codegen_flags: <defaults>
</compile_context>

<pallas_src>
import jax
import jax.numpy as jnp
from jax.experimental import pallas as pl
from jax.experimental.pallas import tpu as pltpu

DIM_IN = 28
DIM_H0 = 256
DIM_H1 = 32
DIM_OUT = 1

# Cap chosen for v7x (64 MiB VMEM per TC); x tile + (TILE_B,256) f32 intermediate
# stay well under budget at this size on all of v5e/v6e/v7x.
_TILE_B_MAX = 4096


def _round_up(n, m):
    return ((n + m - 1) // m) * m


def _mlp_kernel(x_ref, w0_ref, b0_ref, w1_ref, b1_ref, w2r_ref, b2_ref, o_ref):
    # TODO(synk): ACTIVATION_FN[1] is not provided in the source; ReLU assumed.

    # Layer 0: dense0 + act0 (ReLU)   (tile_b, 28) @ (28, 256)
    h0 = jnp.dot(x_ref[...], w0_ref[...], preferred_element_type=jnp.float32)
    h0 = jnp.maximum(h0 + b0_ref[...], 0.0)

    # Layer 1: dense1 + act1 (ReLU)   (tile_b, 256) @ (256, 32)
    h1 = jnp.dot(h0, w1_ref[...], preferred_element_type=jnp.float32)
    h1 = jnp.maximum(h1 + b1_ref[...], 0.0)

    # Output layer (fan_out = 1): an N=1 MXU matmul wastes >99% of MXU columns
    # and pays FIFO latency — use VPU multiply + lane (XLU) reduction instead.
    y = jnp.sum(h1 * w2r_ref[...], axis=-1, keepdims=True) + b2_ref[0, 0]
    o_ref[...] = y.astype(o_ref.dtype)


def neural_net_forward(x, params, *, tile_b=None):
    """x: (B, DIM_IN) float32.  params: dict of weights/biases (see init_params)."""
    B, F = x.shape
    assert F == DIM_IN, f"expected last dim {DIM_IN}, got {F}"

    w0, b0 = params["w0"], params["b0"]
    w1, b1 = params["w1"], params["b1"]
    w2, b2 = params["w2"], params["b2"]

    # w2 is (DIM_H1, 1); present it as a (1, DIM_H1) row for the VPU dot-product.
    w2_row = jnp.reshape(w2, (1, DIM_H1))
    b2 = jnp.reshape(b2, (1, 1))

    if tile_b is None:
        tile_b = min(_TILE_B_MAX, _round_up(B, 8))
    tile_b = max(8, _round_up(tile_b, 8))

    # Pad the batch so the grid divides it exactly; slice the padding back off.
    b_pad = _round_up(B, tile_b)
    if b_pad != B:
        x = jnp.pad(x, ((0, b_pad - B), (0, 0)))
    nb = b_pad // tile_b

    # Weights/biases: full blocks with constant index_maps -> resident in VMEM.
    def resident(shape):
        return pl.BlockSpec(shape, lambda i: tuple(0 for _ in shape))

    flops = 2 * b_pad * (DIM_IN * DIM_H0 + DIM_H0 * DIM_H1 + DIM_H1)
    bytes_accessed = (
        x.size * x.dtype.itemsize
        + b_pad * DIM_OUT * 4
        + sum(a.size * a.dtype.itemsize for a in (w0, b0, w1, b1, w2_row, b2))
    )

    out = pl.pallas_call(
        _mlp_kernel,
        out_shape=jax.ShapeDtypeStruct((b_pad, DIM_OUT), jnp.float32),
        grid_spec=pltpu.PrefetchScalarGridSpec(
            num_scalar_prefetch=0,
            grid=(nb,),
            in_specs=[
                pl.BlockSpec((tile_b, DIM_IN), lambda i: (i, 0)),   # x tile (pipelined)
                resident(w0.shape),
                resident(b0.shape),
                resident(w1.shape),
                resident(b1.shape),
                resident(w2_row.shape),
                pl.BlockSpec(memory_space=pltpu.MemorySpace.SMEM),  # b2 scalar in SMEM
            ],
            out_specs=pl.BlockSpec((tile_b, DIM_OUT), lambda i: (i, 0)),
        ),
        compiler_params=pltpu.CompilerParams(
            dimension_semantics=("parallel",),          # megacore split on v7x
            vmem_limit_bytes=48 * 1024 * 1024,          # > v5e's 16 MiB scoped default
        ),
        cost_estimate=pl.CostEstimate(
            flops=flops, transcendentals=0, bytes_accessed=bytes_accessed
        ),
    )(x, w0, b0, w1, b1, w2_row, b2)

    return out[:B]


def init_params(key):
    """Mimics PyTorch Linear default init: U[-1/sqrt(fan_in), 1/sqrt(fan_in)]."""
    ks = jax.random.split(key, 6)

    def lin(kw, kb, fan_in, fan_out):
        bound = 1.0 / jnp.sqrt(jnp.float32(fan_in))
        w = jax.random.uniform(kw, (fan_in, fan_out), jnp.float32, -bound, bound)
        b = jax.random.uniform(kb, (1, fan_out), jnp.float32, -bound, bound)
        return w, b

    w0, b0 = lin(ks[0], ks[1], DIM_IN, DIM_H0)
    w1, b1 = lin(ks[2], ks[3], DIM_H0, DIM_H1)
    w2, b2 = lin(ks[4], ks[5], DIM_H1, DIM_OUT)
    return {"w0": w0, "b0": b0, "w1": w1, "b1": b1, "w2": w2, "b2": b2}


def _ref_forward(x, p):
    h = jnp.maximum(x @ p["w0"] + p["b0"], 0.0)
    h = jnp.maximum(h @ p["w1"] + p["b1"], 0.0)
    return h @ p["w2"] + p["b2"]


if __name__ == "__main__":
    key = jax.random.PRNGKey(0)
    k_params, k_x = jax.random.split(key)
    params = init_params(k_params)

    # Small demo batch (single grid step).
    B = 8
    x = jax.random.normal(k_x, (B, DIM_IN), jnp.float32)
    y = jax.block_until_ready(neural_net_forward(x, params))
    assert y.shape == (B, DIM_OUT)
    assert jnp.allclose(y, _ref_forward(x, params), atol=1e-5, rtol=1e-5)

    # Exercise the batch-tiling + padding path (multiple grid steps, B % tile != 0).
    B2 = 37
    x2 = jax.random.normal(jax.random.PRNGKey(1), (B2, DIM_IN), jnp.float32)
    y2 = jax.block_until_ready(neural_net_forward(x2, params, tile_b=16))
    assert y2.shape == (B2, DIM_OUT)
    assert jnp.allclose(y2, _ref_forward(x2, params), atol=1e-5, rtol=1e-5)

    print("KERNEL_OK")
</pallas_src>

<mosaic_0001>
module attributes {stable_mosaic.version = 11 : i64} {
  func.func @_mlp_kernel(%arg0: i32, %arg1: memref<8x28xf32, #tpu.memory_space<vmem>>, %arg2: memref<28x256xf32, #tpu.memory_space<vmem>>, %arg3: memref<1x256xf32, #tpu.memory_space<vmem>>, %arg4: memref<256x32xf32, #tpu.memory_space<vmem>>, %arg5: memref<1x32xf32, #tpu.memory_space<vmem>>, %arg6: memref<1x32xf32, #tpu.memory_space<vmem>>, %arg7: memref<1x1xf32, #tpu.memory_space<smem>>, %arg8: memref<8x1xf32, #tpu.memory_space<vmem>>) attributes {dimension_semantics = [#tpu.dimension_semantics<parallel>], iteration_bounds = array<i64: 1>, scalar_prefetch = 0 : i64, scratch_operands = 0 : i64, tpu.core_type = #tpu.core_type<tc>, window_params = [{transform_indices = @transform_0, window_bounds = array<i64: 8, 28>}, {pipeline_mode = #tpu.pipeline_mode<synchronous>, transform_indices = @transform_1, window_bounds = array<i64: 28, 256>}, {pipeline_mode = #tpu.pipeline_mode<synchronous>, transform_indices = @transform_2, window_bounds = array<i64: 1, 256>}, {pipeline_mode = #tpu.pipeline_mode<synchronous>, transform_indices = @transform_3, window_bounds = array<i64: 256, 32>}, {pipeline_mode = #tpu.pipeline_mode<synchronous>, transform_indices = @transform_4, window_bounds = array<i64: 1, 32>}, {pipeline_mode = #tpu.pipeline_mode<synchronous>, transform_indices = @transform_5, window_bounds = array<i64: 1, 32>}, {transform_indices = @transform_6, window_bounds = array<i64: 1, 1>}, {transform_indices = @transform_7, window_bounds = array<i64: 8, 1>}]} {
    %c0 = arith.constant 0 : index
    %c0_0 = arith.constant 0 : index
    %0 = vector.load %arg1[%c0, %c0_0] : memref<8x28xf32, #tpu.memory_space<vmem>>, vector<8x28xf32>
    %c0_1 = arith.constant 0 : index
    %c0_2 = arith.constant 0 : index
    %1 = vector.load %arg2[%c0_1, %c0_2] : memref<28x256xf32, #tpu.memory_space<vmem>>, vector<28x256xf32>
    %cst = arith.constant dense<0.000000e+00> : vector<8x256xf32>
    %2 = tpu.matmul %0, %1, %cst {dimension_numbers = #tpu.dot_dimension_numbers<[1], [0], [0], [1], [0, 0, 1, 1], [], []>} : vector<8x28xf32>, vector<28x256xf32>, vector<8x256xf32> -> vector<8x256xf32>
    %c0_3 = arith.constant 0 : index
    %c0_4 = arith.constant 0 : index
    %3 = vector.load %arg3[%c0_3, %c0_4] : memref<1x256xf32, #tpu.memory_space<vmem>>, vector<1x256xf32>
    %4 = vector.broadcast %3 : vector<1x256xf32> to vector<8x256xf32>
    %5 = arith.addf %2, %4 : vector<8x256xf32>
    %cst_5 = arith.constant 0.000000e+00 : f32
    %6 = vector.broadcast %cst_5 : f32 to vector<8x256xf32>
    %7 = arith.maximumf %5, %6 : vector<8x256xf32>
    %c0_6 = arith.constant 0 : index
    %c0_7 = arith.constant 0 : index
    %8 = vector.load %arg4[%c0_6, %c0_7] : memref<256x32xf32, #tpu.memory_space<vmem>>, vector<256x32xf32>
    %cst_8 = arith.constant dense<0.000000e+00> : vector<8x32xf32>
    %9 = tpu.matmul %7, %8, %cst_8 {dimension_numbers = #tpu.dot_dimension_numbers<[1], [0], [0], [1], [0, 0, 1, 1], [], []>} : vector<8x256xf32>, vector<256x32xf32>, vector<8x32xf32> -> vector<8x32xf32>
    %c0_9 = arith.constant 0 : index
    %c0_10 = arith.constant 0 : index
    %10 = vector.load %arg5[%c0_9, %c0_10] : memref<1x32xf32, #tpu.memory_space<vmem>>, vector<1x32xf32>
    %11 = vector.broadcast %10 : vector<1x32xf32> to vector<8x32xf32>
    %12 = arith.addf %9, %11 : vector<8x32xf32>
    %cst_11 = arith.constant 0.000000e+00 : f32
    %13 = vector.broadcast %cst_11 : f32 to vector<8x32xf32>
    %14 = arith.maximumf %12, %13 : vector<8x32xf32>
    %c0_12 = arith.constant 0 : index
    %c0_13 = arith.constant 0 : index
    %15 = vector.load %arg6[%c0_12, %c0_13] : memref<1x32xf32, #tpu.memory_space<vmem>>, vector<1x32xf32>
    %16 = vector.broadcast %15 : vector<1x32xf32> to vector<8x32xf32>
    %17 = arith.mulf %14, %16 : vector<8x32xf32>
    %cst_14 = arith.constant dense<0.000000e+00> : vector<8xf32>
    %18 = vector.multi_reduction <add>, %17, %cst_14 [1] : vector<8x32xf32> to vector<8xf32>
    %19 = vector.shape_cast %18 : vector<8xf32> to vector<8x1xf32>
    %c0_15 = arith.constant 0 : index
    %c0_16 = arith.constant 0 : index
    %20 = memref.load %arg7[%c0_15, %c0_16] : memref<1x1xf32, #tpu.memory_space<smem>>
    %21 = vector.broadcast %20 : f32 to vector<8x1xf32>
    %22 = arith.addf %19, %21 : vector<8x1xf32>
    %c0_17 = arith.constant 0 : index
    %c0_18 = arith.constant 0 : index
    %23 = vector.load %arg8[%c0_17, %c0_18] : memref<8x1xf32, #tpu.memory_space<vmem>>, vector<8x1xf32>
    tpu.vector_store %arg8[%c0_17, %c0_18], %22 {strides = array<i32>} : memref<8x1xf32, #tpu.memory_space<vmem>>, vector<8x1xf32>,
    return
  }
  func.func @transform_0(%arg0: i32) -> (i32, i32) {
    %c0_i32 = arith.constant 0 : i32
    %c0_i32_0 = arith.constant 0 : i32
    return %arg0, %c0_i32 : i32, i32
  }
  func.func @transform_1(%arg0: i32) -> (i32, i32) {
    %c0_i32 = arith.constant 0 : i32
    %c0_i32_0 = arith.constant 0 : i32
    %c0_i32_1 = arith.constant 0 : i32
    return %c0_i32, %c0_i32_0 : i32, i32
  }
  func.func @transform_2(%arg0: i32) -> (i32, i32) {
    %c0_i32 = arith.constant 0 : i32
    %c0_i32_0 = arith.constant 0 : i32
    %c0_i32_1 = arith.constant 0 : i32
    return %c0_i32, %c0_i32_0 : i32, i32
  }
  func.func @transform_3(%arg0: i32) -> (i32, i32) {
    %c0_i32 = arith.constant 0 : i32
    %c0_i32_0 = arith.constant 0 : i32
    %c0_i32_1 = arith.constant 0 : i32
    return %c0_i32, %c0_i32_0 : i32, i32
  }
  func.func @transform_4(%arg0: i32) -> (i32, i32) {
    %c0_i32 = arith.constant 0 : i32
    %c0_i32_0 = arith.constant 0 : i32
    %c0_i32_1 = arith.constant 0 : i32
    return %c0_i32, %c0_i32_0 : i32, i32
  }
  func.func @transform_5(%arg0: i32) -> (i32, i32) {
    %c0_i32 = arith.constant 0 : i32
    %c0_i32_0 = arith.constant 0 : i32
    %c0_i32_1 = arith.constant 0 : i32
    return %c0_i32, %c0_i32_0 : i32, i32
  }
  func.func @transform_6(%arg0: i32) -> (i32, i32) {
    %c0_i32 = arith.constant 0 : i32
    %c0_i32_0 = arith.constant 0 : i32
    %c0_i32_1 = arith.constant 0 : i32
    return %c0_i32, %c0_i32_0 : i32, i32
  }
  func.func @transform_7(%arg0: i32) -> (i32, i32) {
    %c0_i32 = arith.constant 0 : i32
    %c0_i32_0 = arith.constant 0 : i32
    return %arg0, %c0_i32 : i32, i32
  }
}

</mosaic_0001>

<bundles_post_ra>
// kernel: tpu_custom_call.1
= control target key start
LH: loop header
LB: loop body
LE: loop exit
PB: predicated region body
PF: predicated region fallthrough
CT: control target
= control target key end

     0   :  { %vm52_vm0 = vcmask 1043456   ;;  %v304_v3 = vmov 0.0   ;;  %vm48_vm1 = vcmask 228352   ;;  %v38_v42 = vlaneseq  ;;  %s483_s1 = inlined_call_operand.vmem [shape: f32[28,256], index: 1, kind: input, shape index: {}]   ;;  %s484_s3 = inlined_call_operand.vmem [shape: f32[256,32], index: 3, kind: input, shape index: {}]   ;;  %s485_s0 = inlined_call_operand.vmem [shape: f32[8,28], index: 0, kind: input, shape index: {}]   ;;  %s486_s2 = inlined_call_operand.vmem [shape: f32[1,256], index: 2, kind: input, shape index: {}]   ;;  %s487_s4 = inlined_call_operand.vmem [shape: f32[1,32], index: 4, kind: input, shape index: {}]   ;;  %s488_s5 = inlined_call_operand.vmem [shape: f32[1,32], index: 5, kind: input, shape index: {}]   ;;  %s489_s6 = inlined_call_operand.<no memory space> [shape: f32[1,1], index: 6, kind: input, shape index: {}]   ;;  %s490_s7 = inlined_call_operand.vmem [shape: f32[8,1], index: 7, kind: output, shape index: {}]  }
   0x1   :  { %v35_v0 = vld [vmem:[%s483_s1 + $0x38] sm:$0xf]  ;;  %v34_v1 = vld [vmem:[%s483_s1 + $0x30] sm:$0xf]  ;;  %v33_v2 = vld [vmem:[%s483_s1 + $0x28] sm:$0xff]  ;;  %123 = vmatprep.mubr.f32.mxu0 %v304_v3  ;;  %vm250_vm2 = vcmask 261120  }
   0x2   :  { %263 = vmatprep.subr.msk.mxu0 %vm52_vm0, %v35_v0  ;;  %v32_v4 = vld [vmem:[%s483_s1 + $0x20] sm:$0xff]  ;;  %v31_v5 = vld [vmem:[%s483_s1 + $0x18] sm:$0xff]  ;;  %v30_v6 = vld [vmem:[%s483_s1 + $0x10] sm:$0xff]  ;;  %v39_v43 = vshrl.u32 %v38_v42, 7  ;;  %v255_v0 = vstv %s489_s6  ;;  %vm257_vm3 = vcmask 7168  }
   0x3   :  { %264 = vmatpush1.msk.msra.mxu0 %vm52_vm0, %v34_v1  ;;  %v163_v7 = vld [vmem:[%s484_s3 + $0xf8] sm:$0xff]  ;;  %v162_v9 = vld [vmem:[%s484_s3 + $0xf0] sm:$0xff]  ;;  %v29_v10 = vld [vmem:[%s483_s1 + $0x8] sm:$0xff] }
   0x4   :  { %85 = vmatprep.subr.mxu0 %v33_v2  ;;  %v147_v8 = vld [vmem:[%s484_s3 + $0x78] sm:$0xff]  ;;  %268 = vmatprep.subr.mxu1 %v163_v7  ;;  %v146_v11 = vld [vmem:[%s484_s3 + $0x70] sm:$0xff]  ;;  %v28_v12 = vld [vmem:[%s483_s1] sm:$0xff]  ;;  %v40_v44 = vsub.s32 0, %v39_v43  ;;  %v44_v46 = vsub.s32 1, %v39_v43 }
   0x5   :  { %86 = vmatpush1.msra.mxu0 %v32_v4  ;;  %269 = vmatpush3.msra.mxu1 %v147_v8  ;;  %v161_v13 = vld [vmem:[%s484_s3 + $0xe8] sm:$0xff]  ;;  %v27_v14 = vld [vmem:[%s485_s0] sm:$0xff]  ;;  %v159_v18 = vld [vmem:[%s484_s3 + $0xd8] sm:$0xff] }
   0x6   :  { %87 = vmatprep.subr.mxu0 %v31_v5  ;;  %270 = vmatprep.subr.mxu1 %v162_v9  ;;  %v145_v15 = vld [vmem:[%s484_s3 + $0x68] sm:$0xff]  ;;  %v160_v16 = vld [vmem:[%s484_s3 + $0xe0] sm:$0xff]  ;;  %v143_v19 = vld [vmem:[%s484_s3 + $0x58] sm:$0xff] }
   0x7   :  { %88 = vmatpush1.msra.mxu0 %v30_v6  ;;  %271 = vmatpush3.msra.mxu1 %v146_v11  ;;  %v144_v17 = vld [vmem:[%s484_s3 + $0x60] sm:$0xff]  ;;  %v158_v20 = vld [vmem:[%s484_s3 + $0xd0] sm:$0xff]  ;;  %v157_v22 = vld [vmem:[%s484_s3 + $0xc8] sm:$0xff] }
   0x8   :  { %89 = vmatprep.subr.mxu0 %v29_v10  ;;  %272 = vmatprep.subr.mxu1 %v161_v13  ;;  %v142_v21 = vld [vmem:[%s484_s3 + $0x50] sm:$0xff]  ;;  %v141_v23 = vld [vmem:[%s484_s3 + $0x48] sm:$0xff]  ;;  %v156_v24 = vld [vmem:[%s484_s3 + $0xc0] sm:$0xff] }
   0x9   :  { %90 = vmatpush1.msra.mxu0 %v28_v12  ;;  %273 = vmatpush3.msra.mxu1 %v145_v15  ;;  %v140_v25 = vld [vmem:[%s484_s3 + $0x40] sm:$0xff]  ;;  %v155_v26 = vld [vmem:[%s484_s3 + $0xb8] sm:$0xff]  ;;  %v154_v28 = vld [vmem:[%s484_s3 + $0xb0] sm:$0xff] }
   0xa   :  { %265 = vmatmul.mubr.msk.f32.vlgmr.msra.gmra.mxu0 %vm48_vm1, %v27_v14  ;;  %274 = vmatprep.subr.mxu1 %v160_v16  ;;  %v139_v27 = vld [vmem:[%s484_s3 + $0x38] sm:$0xff]  ;;  %v138_v29 = vld [vmem:[%s484_s3 + $0x30] sm:$0xff]  ;;  %v153_v30 = vld [vmem:[%s484_s3 + $0xa8] sm:$0xff] }
   0xb   :  { %275 = vmatpush3.msra.mxu1 %v144_v17  ;;  %v137_v31 = vld [vmem:[%s484_s3 + $0x28] sm:$0xff]  ;;  %v152_v32 = vld [vmem:[%s484_s3 + $0xa0] sm:$0xff]  ;;  %v151_v34 = vld [vmem:[%s484_s3 + $0x98] sm:$0xff] }
   0xc   :  { %276 = vmatprep.subr.mxu1 %v159_v18  ;;  %v136_v33 = vld [vmem:[%s484_s3 + $0x20] sm:$0xff]  ;;  %v135_v35 = vld [vmem:[%s484_s3 + $0x18] sm:$0xff]  ;;  %v150_v36 = vld [vmem:[%s484_s3 + $0x90] sm:$0xff] }
   0xd   :  { %277 = vmatpush3.msra.mxu1 %v143_v19  ;;  %v134_v37 = vld [vmem:[%s484_s3 + $0x10] sm:$0xff]  ;;  %v149_v38 = vld [vmem:[%s484_s3 + $0x88] sm:$0xff]  ;;  %v148_v40 = vld [vmem:[%s484_s3 + $0x80] sm:$0xff] }
   0xe   :  { %278 = vmatprep.subr.mxu1 %v158_v20  ;;  %v133_v39 = vld [vmem:[%s484_s3 + $0x8] sm:$0xff]  ;;  %v132_v41 = vld [vmem:[%s484_s3] sm:$0xff] }
   0xf   :  { %279 = vmatpush3.msra.mxu1 %v142_v21  ;;  %v36_v45 = vld [vmem:[%s486_s2] sm:$0x3] }
  0x10   :  { %280 = vmatprep.subr.mxu1 %v157_v22  ;;  %v41_v47 = vrot.slane %v36_v45, %v40_v44  ;;  %v45_v48 = vrot.slane %v36_v45, %v44_v46  ;;  %v266_v56 = vld [vmem:[%s487_s4] ss:$0 sm:$0xff] }
  0x11   :  { %281 = vmatpush3.msra.mxu1 %v141_v23  ;;  %v267_v60 = vld [vmem:[%s488_s5] ss:$0 sm:$0xff] }
  0x12   :  { %282 = vmatprep.subr.mxu1 %v156_v24 }
  0x13   :  { %283 = vmatpush3.msra.mxu1 %v140_v25 }
  0x14   :  { %284 = vmatprep.subr.mxu1 %v155_v26 }
  0x15   :  { %285 = vmatpush3.msra.mxu1 %v139_v27 }
  0x16   :  { %286 = vmatprep.subr.mxu1 %v154_v28 }
  0x17   :  { %287 = vmatpush3.msra.mxu1 %v138_v29 }
  0x18   :  { %288 = vmatprep.subr.mxu1 %v153_v30 }
  0x19   :  { %289 = vmatpush3.msra.mxu1 %v137_v31 }
  0x1a   :  { %290 = vmatprep.subr.mxu1 %v152_v32 }
  0x1b   :  { %291 = vmatpush3.msra.mxu1 %v136_v33 }
  0x1c   :  { %292 = vmatprep.subr.mxu1 %v151_v34 }
  0x1d   :  { %293 = vmatpush3.msra.mxu1 %v135_v35 }
  0x1e   :  { %294 = vmatprep.subr.mxu1 %v150_v36 }
  0x1f   :  { %295 = vmatpush3.msra.mxu1 %v134_v37 }
  0x20   :  { %296 = vmatprep.subr.mxu1 %v149_v38 }
  0x21   :  { %297 = vmatpush3.msra.mxu1 %v133_v39 }
  0x22   :  { %298 = vmatprep.subr.mxu1 %v148_v40 }
  0x23   :  { %299 = vmatpush3.msra.mxu1 %v132_v41 }
  0xca   :  { %v125_v49 = vpop.f32.mrf.mxu0 }
  0xcb   :  { %v126_v50 = vadd.f32 %v125_v49, %v41_v47 }
  0xcc   :  { %v127_v51 = vpop.f32.mrf.mxu0 }
  0xcd   :  { %v128_v52 = vadd.f32 %v127_v51, %v45_v48  ;;  %v130_v54 = vmax.f32 %v126_v50, 0.0 }
  0xcf   :  { %v131_v53 = vmax.f32 %v128_v52, 0.0 }
  0xd1   :  { %235 = vmatprep.mubr.f32.mxu1 %v131_v53 }
  0xd2   :  { %236 = vmatmul.mubr.f32.vlgmr.msra.gmra.mxu1 %v130_v54 }
 0x192   :  { %v300_v55 = vpop.f32.mrf.mxu1 }
 0x194   :  { %v301_v57 = vpop.f32.mrf.mxu1 }
 0x195   :  { %v302_v58 = vadd.f32 %v301_v57, %v300_v55 }
 0x197   :  { %v238_v59 = vadd.f32 %v302_v58, %v266_v56 }
 0x199   :  { %v241_v61 = vmax.f32 %v238_v59, 0.0 }
 0x19b   :  { %v249_v62 = vmul.f32 %v267_v60, %v241_v61 }
 0x19d   :  { %v251_v63 = vsel %vm250_vm2, %v249_v62, 0.0 }
 0x19e   :  { %252 = vadd.xlane.f32.xlu0 %v251_v63 }
 0x227   :  { %v253_v1 = vpop.xlane.xlu0 %252 }
 0x228   :  { %v256_v2 = vadd.f32 %v255_v0, %v253_v1 }
 0x22a   :  { %258 = vst.msk [vmem:[%s490_s7] sm:$0xff] %vm257_vm3, %v256_v2 }

</bundles_post_ra>
